<compile_context>
chip_gen: v7x
topology: tpu7x:2x2x1
jax: 0.10.0
libtpu: 0.0.40
codegen_flags: <defaults>
</compile_context>

<pallas_src>
import functools

import jax
import jax.numpy as jnp
from jax.experimental import pallas as pl
from jax.experimental.pallas import tpu as pltpu

_LANE = 128


def _round_up(x, m):
    return ((x + m - 1) // m) * m


def _leaky_relu(x, slope=0.1):
    return jnp.where(x > 0, x, slope * x)


# --------------------------------------------------------------------------
# Kernel: fused 4-layer MLP (Linear + LeakyReLU x3, Linear + Tanh)
# --------------------------------------------------------------------------
def generator_kernel(z_ref,
                     w1_ref, b1_ref,
                     w2_ref, b2_ref,
                     w3_ref, b3_ref,
                     w4_ref, b4_ref,
                     out_ref):
    # fc1: bf16 x bf16 -> f32 accumulate; epilogue in f32.
    h = jnp.dot(z_ref[...], w1_ref[...], preferred_element_type=jnp.float32)
    h = _leaky_relu(h + b1_ref[...])

    # fc2
    h = jnp.dot(h.astype(w2_ref.dtype), w2_ref[...],
                preferred_element_type=jnp.float32)
    h = _leaky_relu(h + b2_ref[...])

    # fc3
    h = jnp.dot(h.astype(w3_ref.dtype), w3_ref[...],
                preferred_element_type=jnp.float32)
    h = _leaky_relu(h + b3_ref[...])

    # fc4 + tanh
    h = jnp.dot(h.astype(w4_ref.dtype), w4_ref[...],
                preferred_element_type=jnp.float32)
    out_ref[...] = jnp.tanh(h + b4_ref[...]).astype(out_ref.dtype)


# --------------------------------------------------------------------------
# Parameter helpers
# --------------------------------------------------------------------------
def init_generator_params(key, output_size, hidden_size, latent_size,
                          conditional=False, num_classes=10, dtype=jnp.float32):
    """Deterministic synthetic parameters with nn.Linear shapes.

    Weights are [in, out] (transposed vs. PyTorch's [out, in]); biases [1, out].
    """
    nc = num_classes if conditional else 0
    dims = [
        (latent_size + nc, hidden_size),      # fc1
        (hidden_size, hidden_size),           # fc2
        (hidden_size, hidden_size * 2),       # fc3
        (hidden_size * 2, output_size),       # fc4
    ]
    params = []
    for (fan_in, fan_out) in dims:
        key, kw, kb = jax.random.split(key, 3)
        bound = 1.0 / (fan_in ** 0.5)  # PyTorch default Linear init range
        w = jax.random.uniform(kw, (fan_in, fan_out), dtype, -bound, bound)
        b = jax.random.uniform(kb, (1, fan_out), dtype, -bound, bound)
        params.extend([w, b])
    return tuple(params)


def _pad2(a, rows, cols):
    return jnp.pad(a, ((0, rows - a.shape[0]), (0, cols - a.shape[1])))


def prepare_padded_params(params, compute_dtype=jnp.bfloat16):
    """One-time: pad every feature dim to a multiple of 128 (lane-dense) and
    cast weights to bf16 for the MXU; biases stay f32 for the VPU epilogue."""
    w1, b1, w2, b2, w3, b3, w4, b4 = params
    out = []
    for (w, b) in ((w1, b1), (w2, b2), (w3, b3), (w4, b4)):
        fan_in, fan_out = w.shape
        fi_p, fo_p = _round_up(fan_in, _LANE), _round_up(fan_out, _LANE)
        out.append(_pad2(w, fi_p, fo_p).astype(compute_dtype))
        out.append(_pad2(b, 1, fo_p).astype(jnp.float32))
    return tuple(out)


# --------------------------------------------------------------------------
# Forward wrapper
# --------------------------------------------------------------------------
@functools.partial(
    jax.jit,
    static_argnames=("output_size", "conditional", "num_classes", "block_batch"))
def generator_forward(z, padded_params, *, output_size, y=None,
                      conditional=False, num_classes=10, block_batch=256):
    """Mirrors Generator.forward: z.view(B,-1), optional one-hot concat, 4 FC."""
    orig_dtype = z.dtype
    z = z.reshape(z.shape[0], -1)
    if conditional:
        # TODO(synk): could be fused in-kernel as a w1_y[y] row-gather via
        # scalar prefetch; with the contraction dim padded to 128 anyway the
        # one-hot concat costs nothing extra here.
        y_oh = jax.nn.one_hot(y.astype(jnp.int32), num_classes, dtype=z.dtype)
        z = jnp.concatenate([z, y_oh], axis=-1)

    w1, b1, w2, b2, w3, b3, w4, b4 = padded_params
    batch, d_in = z.shape
    d_in_p = w1.shape[0]
    d_out_p = w4.shape[1]

    # Batch tile: large enough to amortize per-step overhead, (16,128)-aligned
    # for the bf16 input tile.  Small batches get a single full-extent tile.
    tm = block_batch if batch >= block_batch else _round_up(batch, 16)
    batch_p = _round_up(batch, tm)

    # Lane-dense bf16 input slab; zero padding is inert through the network.
    z_p = jnp.zeros((batch_p, d_in_p), jnp.bfloat16)
    z_p = z_p.at[:batch, :d_in].set(z.astype(jnp.bfloat16))

    def resident(arr):
        return pl.BlockSpec(arr.shape, lambda i: (0, 0))

    out = pl.pallas_call(
        generator_kernel,
        out_shape=jax.ShapeDtypeStruct((batch_p, d_out_p), jnp.float32),
        grid_spec=pltpu.PrefetchScalarGridSpec(
            num_scalar_prefetch=0,
            grid=(batch_p // tm,),
            in_specs=[
                pl.BlockSpec((tm, d_in_p), lambda i: (i, 0)),   # z tile
                resident(w1), resident(b1),
                resident(w2), resident(b2),
                resident(w3), resident(b3),
                resident(w4), resident(b4),
            ],
            out_specs=pl.BlockSpec((tm, d_out_p), lambda i: (i, 0)),
        ),
        compiler_params=pltpu.CompilerParams(
            dimension_semantics=("parallel",),        # v7x: shard batch across 2 TCs
            vmem_limit_bytes=48 * 1024 * 1024,        # fits v7x's 64 MiB VMEM
        ),
    )(z_p, w1, b1, w2, b2, w3, b3, w4, b4)

    return out[:batch, :output_size].astype(orig_dtype)


# --------------------------------------------------------------------------
# Pure-JAX reference (f32, unpadded) for correctness checking
# --------------------------------------------------------------------------
def _reference_forward(z, params, y=None, conditional=False, num_classes=10):
    z = z.reshape(z.shape[0], -1)
    if conditional:
        z = jnp.concatenate(
            [z, jax.nn.one_hot(y.astype(jnp.int32), num_classes, dtype=z.dtype)], -1)
    w1, b1, w2, b2, w3, b3, w4, b4 = params
    h = _leaky_relu(z @ w1 + b1)
    h = _leaky_relu(h @ w2 + b2)
    h = _leaky_relu(h @ w3 + b3)
    return jnp.tanh(h @ w4 + b4)


if __name__ == "__main__":
    batch = 8
    latent_size = 32
    hidden_size = 32
    output_size = 64

    key = jax.random.PRNGKey(0)
    kz, kp, kpc, ky, kz2 = jax.random.split(key, 5)

    # --- unconditional ------------------------------------------------------
    z = jax.random.normal(kz, (batch, latent_size), jnp.float32)
    params = init_generator_params(kp, output_size, hidden_size, latent_size,
                                   conditional=False)
    padded = prepare_padded_params(params)

    out = generator_forward(z, padded, output_size=output_size,
                            conditional=False)
    out = jax.block_until_ready(out)
    ref = _reference_forward(z, params, conditional=False)
    assert out.shape == (batch, output_size)
    assert jnp.allclose(out, ref, atol=2e-2, rtol=2e-2), \
        float(jnp.max(jnp.abs(out - ref)))

    # --- conditional (one-hot concat) ---------------------------------------
    num_classes = 10
    params_c = init_generator_params(kpc, output_size, hidden_size, latent_size,
                                     conditional=True, num_classes=num_classes)
    padded_c = prepare_padded_params(params_c)
    y = jax.random.randint(ky, (batch,), 0, num_classes)

    out_c = generator_forward(z, padded_c, output_size=output_size, y=y,
                              conditional=True, num_classes=num_classes)
    out_c = jax.block_until_ready(out_c)
    ref_c = _reference_forward(z, params_c, y=y, conditional=True,
                               num_classes=num_classes)
    assert out_c.shape == (batch, output_size)
    assert jnp.allclose(out_c, ref_c, atol=2e-2, rtol=2e-2), \
        float(jnp.max(jnp.abs(out_c - ref_c)))

    # --- larger batch to exercise the batch grid (grid > 1, padded rows) ----
    big_batch = 320
    z_big = jax.random.normal(kz2, (big_batch, latent_size), jnp.float32)
    out_big = generator_forward(z_big, padded, output_size=output_size,
                                conditional=False)
    out_big = jax.block_until_ready(out_big)
    ref_big = _reference_forward(z_big, params, conditional=False)
    assert out_big.shape == (big_batch, output_size)
    assert jnp.allclose(out_big, ref_big, atol=2e-2, rtol=2e-2), \
        float(jnp.max(jnp.abs(out_big - ref_big)))

    print("KERNEL_OK")
</pallas_src>

<mosaic_0001>
module attributes {stable_mosaic.version = 11 : i64} {
  func.func @generator_kernel(%arg0: i32, %arg1: memref<16x128xbf16, #tpu.memory_space<vmem>>, %arg2: memref<128x128xbf16, #tpu.memory_space<vmem>>, %arg3: memref<1x128xf32, #tpu.memory_space<vmem>>, %arg4: memref<128x128xbf16, #tpu.memory_space<vmem>>, %arg5: memref<1x128xf32, #tpu.memory_space<vmem>>, %arg6: memref<128x128xbf16, #tpu.memory_space<vmem>>, %arg7: memref<1x128xf32, #tpu.memory_space<vmem>>, %arg8: memref<128x128xbf16, #tpu.memory_space<vmem>>, %arg9: memref<1x128xf32, #tpu.memory_space<vmem>>, %arg10: memref<16x128xf32, #tpu.memory_space<vmem>>) attributes {dimension_semantics = [#tpu.dimension_semantics<parallel>], iteration_bounds = array<i64: 1>, scalar_prefetch = 0 : i64, scratch_operands = 0 : i64, tpu.core_type = #tpu.core_type<tc>, window_params = [{transform_indices = @transform_0, window_bounds = array<i64: 16, 128>}, {pipeline_mode = #tpu.pipeline_mode<synchronous>, transform_indices = @transform_1, window_bounds = array<i64: 128, 128>}, {pipeline_mode = #tpu.pipeline_mode<synchronous>, transform_indices = @transform_2, window_bounds = array<i64: 1, 128>}, {pipeline_mode = #tpu.pipeline_mode<synchronous>, transform_indices = @transform_3, window_bounds = array<i64: 128, 128>}, {pipeline_mode = #tpu.pipeline_mode<synchronous>, transform_indices = @transform_4, window_bounds = array<i64: 1, 128>}, {pipeline_mode = #tpu.pipeline_mode<synchronous>, transform_indices = @transform_5, window_bounds = array<i64: 128, 128>}, {pipeline_mode = #tpu.pipeline_mode<synchronous>, transform_indices = @transform_6, window_bounds = array<i64: 1, 128>}, {pipeline_mode = #tpu.pipeline_mode<synchronous>, transform_indices = @transform_7, window_bounds = array<i64: 128, 128>}, {pipeline_mode = #tpu.pipeline_mode<synchronous>, transform_indices = @transform_8, window_bounds = array<i64: 1, 128>}, {transform_indices = @transform_9, window_bounds = array<i64: 16, 128>}]} {
    %c0 = arith.constant 0 : index
    %c0_0 = arith.constant 0 : index
    %0 = vector.load %arg1[%c0, %c0_0] : memref<16x128xbf16, #tpu.memory_space<vmem>>, vector<16x128xbf16>
    %c0_1 = arith.constant 0 : index
    %c0_2 = arith.constant 0 : index
    %1 = vector.load %arg2[%c0_1, %c0_2] : memref<128x128xbf16, #tpu.memory_space<vmem>>, vector<128x128xbf16>
    %cst = arith.constant dense<0.000000e+00> : vector<16x128xf32>
    %2 = tpu.matmul %0, %1, %cst {dimension_numbers = #tpu.dot_dimension_numbers<[1], [0], [0], [1], [0, 0, 1, 1], [], []>} : vector<16x128xbf16>, vector<128x128xbf16>, vector<16x128xf32> -> vector<16x128xf32>
    %c0_3 = arith.constant 0 : index
    %c0_4 = arith.constant 0 : index
    %3 = vector.load %arg3[%c0_3, %c0_4] : memref<1x128xf32, #tpu.memory_space<vmem>>, vector<1x128xf32>
    %4 = vector.broadcast %3 : vector<1x128xf32> to vector<16x128xf32>
    %5 = arith.addf %2, %4 : vector<16x128xf32>
    %cst_5 = arith.constant 0.000000e+00 : f32
    %6 = vector.broadcast %cst_5 : f32 to vector<16x128xf32>
    %7 = arith.cmpf ogt, %5, %6 : vector<16x128xf32>
    %cst_6 = arith.constant 1.000000e-01 : f32
    %8 = vector.broadcast %cst_6 : f32 to vector<16x128xf32>
    %9 = arith.mulf %8, %5 : vector<16x128xf32>
    %10 = arith.select %7, %5, %9 : vector<16x128xi1>, vector<16x128xf32>
    %11 = arith.truncf %10 : vector<16x128xf32> to vector<16x128xbf16>
    %c0_7 = arith.constant 0 : index
    %c0_8 = arith.constant 0 : index
    %12 = vector.load %arg4[%c0_7, %c0_8] : memref<128x128xbf16, #tpu.memory_space<vmem>>, vector<128x128xbf16>
    %cst_9 = arith.constant dense<0.000000e+00> : vector<16x128xf32>
    %13 = tpu.matmul %11, %12, %cst_9 {dimension_numbers = #tpu.dot_dimension_numbers<[1], [0], [0], [1], [0, 0, 1, 1], [], []>} : vector<16x128xbf16>, vector<128x128xbf16>, vector<16x128xf32> -> vector<16x128xf32>
    %c0_10 = arith.constant 0 : index
    %c0_11 = arith.constant 0 : index
    %14 = vector.load %arg5[%c0_10, %c0_11] : memref<1x128xf32, #tpu.memory_space<vmem>>, vector<1x128xf32>
    %15 = vector.broadcast %14 : vector<1x128xf32> to vector<16x128xf32>
    %16 = arith.addf %13, %15 : vector<16x128xf32>
    %cst_12 = arith.constant 0.000000e+00 : f32
    %17 = vector.broadcast %cst_12 : f32 to vector<16x128xf32>
    %18 = arith.cmpf ogt, %16, %17 : vector<16x128xf32>
    %cst_13 = arith.constant 1.000000e-01 : f32
    %19 = vector.broadcast %cst_13 : f32 to vector<16x128xf32>
    %20 = arith.mulf %19, %16 : vector<16x128xf32>
    %21 = arith.select %18, %16, %20 : vector<16x128xi1>, vector<16x128xf32>
    %22 = arith.truncf %21 : vector<16x128xf32> to vector<16x128xbf16>
    %c0_14 = arith.constant 0 : index
    %c0_15 = arith.constant 0 : index
    %23 = vector.load %arg6[%c0_14, %c0_15] : memref<128x128xbf16, #tpu.memory_space<vmem>>, vector<128x128xbf16>
    %cst_16 = arith.constant dense<0.000000e+00> : vector<16x128xf32>
    %24 = tpu.matmul %22, %23, %cst_16 {dimension_numbers = #tpu.dot_dimension_numbers<[1], [0], [0], [1], [0, 0, 1, 1], [], []>} : vector<16x128xbf16>, vector<128x128xbf16>, vector<16x128xf32> -> vector<16x128xf32>
    %c0_17 = arith.constant 0 : index
    %c0_18 = arith.constant 0 : index
    %25 = vector.load %arg7[%c0_17, %c0_18] : memref<1x128xf32, #tpu.memory_space<vmem>>, vector<1x128xf32>
    %26 = vector.broadcast %25 : vector<1x128xf32> to vector<16x128xf32>
    %27 = arith.addf %24, %26 : vector<16x128xf32>
    %cst_19 = arith.constant 0.000000e+00 : f32
    %28 = vector.broadcast %cst_19 : f32 to vector<16x128xf32>
    %29 = arith.cmpf ogt, %27, %28 : vector<16x128xf32>
    %cst_20 = arith.constant 1.000000e-01 : f32
    %30 = vector.broadcast %cst_20 : f32 to vector<16x128xf32>
    %31 = arith.mulf %30, %27 : vector<16x128xf32>
    %32 = arith.select %29, %27, %31 : vector<16x128xi1>, vector<16x128xf32>
    %33 = arith.truncf %32 : vector<16x128xf32> to vector<16x128xbf16>
    %c0_21 = arith.constant 0 : index
    %c0_22 = arith.constant 0 : index
    %34 = vector.load %arg8[%c0_21, %c0_22] : memref<128x128xbf16, #tpu.memory_space<vmem>>, vector<128x128xbf16>
    %cst_23 = arith.constant dense<0.000000e+00> : vector<16x128xf32>
    %35 = tpu.matmul %33, %34, %cst_23 {dimension_numbers = #tpu.dot_dimension_numbers<[1], [0], [0], [1], [0, 0, 1, 1], [], []>} : vector<16x128xbf16>, vector<128x128xbf16>, vector<16x128xf32> -> vector<16x128xf32>
    %c0_24 = arith.constant 0 : index
    %c0_25 = arith.constant 0 : index
    %36 = vector.load %arg9[%c0_24, %c0_25] : memref<1x128xf32, #tpu.memory_space<vmem>>, vector<1x128xf32>
    %37 = vector.broadcast %36 : vector<1x128xf32> to vector<16x128xf32>
    %38 = arith.addf %35, %37 : vector<16x128xf32>
    %39 = math.tanh %38 : vector<16x128xf32>
    %c0_26 = arith.constant 0 : index
    %c0_27 = arith.constant 0 : index
    %40 = vector.load %arg10[%c0_26, %c0_27] : memref<16x128xf32, #tpu.memory_space<vmem>>, vector<16x128xf32>
    tpu.vector_store %arg10[%c0_26, %c0_27], %39 {strides = array<i32>} : memref<16x128xf32, #tpu.memory_space<vmem>>, vector<16x128xf32>,
    return
  }
  func.func @transform_0(%arg0: i32) -> (i32, i32) {
    %c0_i32 = arith.constant 0 : i32
    %c0_i32_0 = arith.constant 0 : i32
    return %arg0, %c0_i32 : i32, i32
  }
  func.func @transform_1(%arg0: i32) -> (i32, i32) {
    %c0_i32 = arith.constant 0 : i32
    %c0_i32_0 = arith.constant 0 : i32
    %c0_i32_1 = arith.constant 0 : i32
    return %c0_i32, %c0_i32_0 : i32, i32
  }
  func.func @transform_2(%arg0: i32) -> (i32, i32) {
    %c0_i32 = arith.constant 0 : i32
    %c0_i32_0 = arith.constant 0 : i32
    %c0_i32_1 = arith.constant 0 : i32
    return %c0_i32, %c0_i32_0 : i32, i32
  }
  func.func @transform_3(%arg0: i32) -> (i32, i32) {
    %c0_i32 = arith.constant 0 : i32
    %c0_i32_0 = arith.constant 0 : i32
    %c0_i32_1 = arith.constant 0 : i32
    return %c0_i32, %c0_i32_0 : i32, i32
  }
  func.func @transform_4(%arg0: i32) -> (i32, i32) {
    %c0_i32 = arith.constant 0 : i32
    %c0_i32_0 = arith.constant 0 : i32
    %c0_i32_1 = arith.constant 0 : i32
    return %c0_i32, %c0_i32_0 : i32, i32
  }
  func.func @transform_5(%arg0: i32) -> (i32, i32) {
    %c0_i32 = arith.constant 0 : i32
    %c0_i32_0 = arith.constant 0 : i32
    %c0_i32_1 = arith.constant 0 : i32
    return %c0_i32, %c0_i32_0 : i32, i32
  }
  func.func @transform_6(%arg0: i32) -> (i32, i32) {
    %c0_i32 = arith.constant 0 : i32
    %c0_i32_0 = arith.constant 0 : i32
    %c0_i32_1 = arith.constant 0 : i32
    return %c0_i32, %c0_i32_0 : i32, i32
  }
  func.func @transform_7(%arg0: i32) -> (i32, i32) {
    %c0_i32 = arith.constant 0 : i32
    %c0_i32_0 = arith.constant 0 : i32
    %c0_i32_1 = arith.constant 0 : i32
    return %c0_i32, %c0_i32_0 : i32, i32
  }
  func.func @transform_8(%arg0: i32) -> (i32, i32) {
    %c0_i32 = arith.constant 0 : i32
    %c0_i32_0 = arith.constant 0 : i32
    %c0_i32_1 = arith.constant 0 : i32
    return %c0_i32, %c0_i32_0 : i32, i32
  }
  func.func @transform_9(%arg0: i32) -> (i32, i32) {
    %c0_i32 = arith.constant 0 : i32
    %c0_i32_0 = arith.constant 0 : i32
    return %arg0, %c0_i32 : i32, i32
  }
}

</mosaic_0001>

<bundles_post_ra>
// kernel: generator_forward.1
= control target key start
LH: loop header
LB: loop body
LE: loop exit
PB: predicated region body
PF: predicated region fallthrough
CT: control target
= control target key end

     0   :  { %14 = vsyncpa [#allocation3], 0  ;;  %s1061_s0 = inlined_call_operand.vmem [shape: bf16[16,128], index: 0, kind: input, shape index: {}]   ;;  %s1062_s1 = inlined_call_operand.hbm [shape: bf16[128,128], index: 1, kind: input, shape index: {}]   ;;  %s1063_s2 = inlined_call_operand.vmem [shape: f32[1,128], index: 2, kind: input, shape index: {}]   ;;  %s1064_s3 = inlined_call_operand.hbm [shape: bf16[128,128], index: 3, kind: input, shape index: {}]   ;;  %s1065_s4 = inlined_call_operand.vmem [shape: f32[1,128], index: 4, kind: input, shape index: {}]   ;;  %s1066_s5 = inlined_call_operand.hbm [shape: bf16[128,128], index: 5, kind: input, shape index: {}]   ;;  %s1067_s6 = inlined_call_operand.vmem [shape: f32[1,128], index: 6, kind: input, shape index: {}]   ;;  %s1068_s7 = inlined_call_operand.hbm [shape: bf16[128,128], index: 7, kind: input, shape index: {}]   ;;  %s1069_s8 = inlined_call_operand.vmem [shape: f32[1,128], index: 8, kind: input, shape index: {}]   ;;  %s1070_s9 = inlined_call_operand.vmem [shape: f32[16,128], index: 9, kind: output, shape index: {}]  }
   0x1   :  { %15 = vsyncpa [#allocation5], 0 }
   0x2   :  { %16 = vsyncpa [#allocation8], 0  ;;  %s868_s30 = smov [#allocation4]   ;;  %s869_s11 = smov [#allocation2]  }
   0x3   :  { %s38_s10 = sshll.u32 %s868_s30, 4  ;;  %s24_s12 = sshll.u32 %s869_s11, 4  ;;  %s39_s10 = int_to_ptr.vmem [resolvable:$true] %s38_s10  ;;  %s926_s12 = int_to_ptr.vmem [resolvable:$true] %s24_s12 }
   0x4   :  { %s774_s15 = scalar_lea.hbm %s1064_s3, 1024 }
   0x5   :  { %p775_p0 = scmp.ne.s32.totalorder %s1064_s3, %s774_s15  ;;  %p778_p1 = scmp.lt.u32.totalorder %s774_s15, %s1064_s3 }
   0x7   :  { %p780_p2 = pnand %p778_p1, %p775_p0 }
   0x9   :  { %783 = shalt.err (!%p780_p2)
}
   0xa   :  { %s784_s20 = scalar_lea.vmem %s39_s10, 1024  ;;  %p789_p4 = scmp.lt.s32.totalorder %s39_s10, %s39_s10 }
   0xb   :  { %p785_p3 = scmp.ne.s32.totalorder %s39_s10, %s784_s20  ;;  %p790_p5 = scmp.lt.s32.totalorder %s784_s20, %s784_s20 }
   0xd   :  { %p791_p6 = por %p790_p5, %p789_p4 }
   0xf   :  { %p792_p7 = pnand %p791_p6, %p785_p3 }
  0x11   :  { %795 = shalt.err (!%p792_p7)
}
  0x12   :  { %s870_s21 = smov 64   ;;  %s871_s22 = smov 4  }
  0x13   :  { %44 = dma.hbm_to_vmem [thread:$0]  %s1064_s3, 1024, %s39_s10, [#allocation5], %s870_s21, %s870_s21, %s871_s22  }
  0x14   :  { %s796_s27 = scalar_lea.hbm %s1062_s1, 1024 }
  0x15   :  { %p797_p8 = scmp.ne.s32.totalorder %s1062_s1, %s796_s27  ;;  %p800_p9 = scmp.lt.u32.totalorder %s796_s27, %s1062_s1 }
  0x17   :  { %p802_p10 = pnand %p800_p9, %p797_p8 }
  0x19   :  { %805 = shalt.err (!%p802_p10)
}
  0x1a   :  { %s806_s13 = scalar_lea.vmem %s926_s12, 1024  ;;  %p811_p12 = scmp.lt.s32.totalorder %s926_s12, %s926_s12 }
  0x1b   :  { %p807_p11 = scmp.ne.s32.totalorder %s926_s12, %s806_s13  ;;  %p812_p13 = scmp.lt.s32.totalorder %s806_s13, %s806_s13 }
  0x1d   :  { %p813_p0 = por %p812_p13, %p811_p12 }
  0x1f   :  { %p814_p1 = pnand %p813_p0, %p807_p11 }
  0x21   :  { %817 = shalt.err (!%p814_p1)
}
  0x22   :  { %30 = dma.hbm_to_vmem [thread:$0]  %s1062_s1, 1024, %s926_s12, [#allocation3], %s870_s21, %s870_s21, %s871_s22  }
  0x23   :  { %s872_s14 = smov [#allocation6]   ;;  %s873_s16 = smov [#allocation7]  }
  0x24   :  { %s52_s15 = sshll.u32 %s872_s14, 4  ;;  %s66_s17 = sshll.u32 %s873_s16, 4  ;;  %s53_s15 = int_to_ptr.vmem [resolvable:$true] %s52_s15  ;;  %s963_s17 = int_to_ptr.vmem [resolvable:$true] %s66_s17 }
  0x25   :  { %s818_s20 = scalar_lea.hbm %s1066_s5, 1024 }
  0x26   :  { %p819_p2 = scmp.ne.s32.totalorder %s1066_s5, %s818_s20  ;;  %p822_p3 = scmp.lt.u32.totalorder %s818_s20, %s1066_s5 }
  0x28   :  { %p824_p4 = pnand %p822_p3, %p819_p2 }
  0x2a   :  { %827 = shalt.err (!%p824_p4)
}
  0x2b   :  { %s828_s1 = scalar_lea.vmem %s53_s15, 1024  ;;  %p833_p6 = scmp.lt.s32.totalorder %s53_s15, %s53_s15 }
  0x2c   :  { %p829_p5 = scmp.ne.s32.totalorder %s53_s15, %s828_s1  ;;  %p834_p7 = scmp.lt.s32.totalorder %s828_s1, %s828_s1 }
  0x2e   :  { %p835_p8 = por %p834_p7, %p833_p6 }
  0x30   :  { %p836_p9 = pnand %p835_p8, %p829_p5 }
  0x32   :  { %839 = shalt.err (!%p836_p9)
}
  0x33   :  { %58 = dma.hbm_to_vmem [thread:$0]  %s1066_s5, 1024, %s53_s15, [#allocation5], %s870_s21, %s870_s21, %s871_s22  }
  0x34   :  { %s840_s30 = scalar_lea.hbm %s1068_s7, 1024 }
  0x35   :  { %p841_p10 = scmp.ne.s32.totalorder %s1068_s7, %s840_s30  ;;  %p844_p11 = scmp.lt.u32.totalorder %s840_s30, %s1068_s7 }
  0x37   :  { %p846_p12 = pnand %p844_p11, %p841_p10 }
  0x39   :  { %849 = shalt.err (!%p846_p12)
}
  0x3a   :  { %s850_s14 = scalar_lea.vmem %s963_s17, 1024  ;;  %p855_p0 = scmp.lt.s32.totalorder %s963_s17, %s963_s17 }
  0x3b   :  { %p851_p13 = scmp.ne.s32.totalorder %s963_s17, %s850_s14  ;;  %p856_p1 = scmp.lt.s32.totalorder %s850_s14, %s850_s14 }
  0x3d   :  { %p857_p2 = por %p856_p1, %p855_p0 }
  0x3f   :  { %p858_p3 = pnand %p857_p2, %p851_p13 }
  0x41   :  { %861 = shalt.err (!%p858_p3)
}
  0x42   :  { %72 = dma.hbm_to_vmem [thread:$0]  %s1068_s7, 1024, %s963_s17, [#allocation8], %s870_s21, %s870_s21, %s871_s22  }
  0x43   :  { %862 = dma.done.wait [#allocation3], 1024  }
  0x44   :  { %863 = vsyncadd [#allocation3], 4294966272 }
  0x45   :  { %864 = dma.done.wait [#allocation5], 2048  }
  0x46   :  { %865 = vsyncadd [#allocation5], 4294965248 }
  0x47   :  { %866 = dma.done.wait [#allocation8], 1024  }
  0x48   :  { %867 = vsyncadd [#allocation8], 4294966272  ;;  %v874_v0 = vmov 0.0   ;;  %vm875_vm0 = vmmov 0   ;;  %v737_v1 = vld [vmem:[#allocation2] sm:$0xff]   ;;  %v738_v2 = vld [vmem:[#allocation2 + $0x8] sm:$0xff]  }
  0x49   :  { %649 = vmatprep.subr.bf16.mxu0 %v874_v0  ;;  %665 = vmatprep.mubr.msk.bf16.mxu0 %vm875_vm0, %v874_v0  ;;  %v739_v3 = vld [vmem:[#allocation2 + $0x10] sm:$0xff]   ;;  %v746_v4 = vld [vmem:[#allocation4] sm:$0xff]   ;;  %v740_v5 = vld [vmem:[#allocation2 + $0x18] sm:$0xff]  }
  0x4a   :  { %669 = vmatprep.subr.bf16.mxu1 %v874_v0  ;;  %685 = vmatprep.mubr.msk.bf16.mxu1 %vm875_vm0, %v874_v0  ;;  %v747_v6 = vld [vmem:[#allocation4 + $0x8] sm:$0xff]   ;;  %v741_v7 = vld [vmem:[#allocation2 + $0x20] sm:$0xff]   ;;  %v748_v8 = vld [vmem:[#allocation4 + $0x10] sm:$0xff]  }
  0x4b   :  { %650 = vmatpush3.bf16.msra.mxu0 %v737_v1  ;;  %670 = vmatpush3.bf16.msra.mxu1 %v746_v4  ;;  %v742_v9 = vld [vmem:[#allocation2 + $0x28] sm:$0xff]   ;;  %v749_v10 = vld [vmem:[#allocation4 + $0x18] sm:$0xff]   ;;  %v743_v11 = vld [vmem:[#allocation2 + $0x30] sm:$0xff]  }
  0x4c   :  { %651 = vmatprep.subr.bf16.mxu0 %v874_v0  ;;  %671 = vmatprep.subr.bf16.mxu1 %v874_v0  ;;  %v750_v12 = vld [vmem:[#allocation4 + $0x20] sm:$0xff]   ;;  %v744_v13 = vld [vmem:[#allocation2 + $0x38] sm:$0xff]   ;;  %v751_v14 = vld [vmem:[#allocation4 + $0x28] sm:$0xff]  }
  0x4d   :  { %v745_v15 = vld [vmem:[%s1061_s0] sm:$0xff]   ;;  %v752_v16 = vld [vmem:[#allocation4 + $0x30] sm:$0xff]   ;;  %v753_v17 = vld [vmem:[#allocation4 + $0x38] sm:$0xff]  }
  0x4e   :  { %v754_v18 = vld [vmem:[#allocation6] sm:$0xff]   ;;  %v755_v19 = vld [vmem:[#allocation6 + $0x8] sm:$0xff]   ;;  %v756_v20 = vld [vmem:[#allocation6 + $0x10] sm:$0xff]  }
  0x4f   :  { %652 = vmatpush3.bf16.msra.mxu0 %v738_v2  ;;  %672 = vmatpush3.bf16.msra.mxu1 %v747_v6  ;;  %v757_v21 = vld [vmem:[#allocation6 + $0x18] sm:$0xff]   ;;  %v758_v22 = vld [vmem:[#allocation6 + $0x20] sm:$0xff]   ;;  %v759_v23 = vld [vmem:[#allocation6 + $0x28] sm:$0xff]  }
  0x50   :  { %653 = vmatprep.subr.bf16.mxu0 %v874_v0  ;;  %673 = vmatprep.subr.bf16.mxu1 %v874_v0  ;;  %v576_v24 = vld [vmem:[%s1063_s2] ss:$0 sm:$0xff]  ;;  %v760_v36 = vld [vmem:[#allocation6 + $0x30] sm:$0xff]   ;;  %v761_v37 = vld [vmem:[#allocation6 + $0x38] sm:$0xff]  }
  0x51   :  { %v762_v38 = vld [vmem:[#allocation7] sm:$0xff]   ;;  %v763_v39 = vld [vmem:[#allocation7 + $0x8] sm:$0xff]   ;;  %v764_v40 = vld [vmem:[#allocation7 + $0x10] sm:$0xff]  }
  0x52   :  { %v765_v41 = vld [vmem:[#allocation7 + $0x18] sm:$0xff]   ;;  %v766_v42 = vld [vmem:[#allocation7 + $0x20] sm:$0xff]   ;;  %v767_v43 = vld [vmem:[#allocation7 + $0x28] sm:$0xff]  }
  0x53   :  { %654 = vmatpush3.bf16.msra.mxu0 %v739_v3  ;;  %674 = vmatpush3.bf16.msra.mxu1 %v748_v8  ;;  %v586_v44 = vld [vmem:[%s1065_s4] ss:$0 sm:$0xff]  ;;  %v768_v56 = vld [vmem:[#allocation7 + $0x30] sm:$0xff]   ;;  %v769_v57 = vld [vmem:[#allocation7 + $0x38] sm:$0xff]  }
  0x54   :  { %655 = vmatprep.subr.bf16.mxu0 %v874_v0  ;;  %675 = vmatprep.subr.bf16.mxu1 %v874_v0  ;;  %v595_v58 = vld [vmem:[%s1067_s6] ss:$0 sm:$0xff] }
  0x57   :  { %656 = vmatpush3.bf16.msra.mxu0 %v740_v5  ;;  %676 = vmatpush3.bf16.msra.mxu1 %v749_v10 }
  0x58   :  { %657 = vmatprep.subr.bf16.mxu0 %v874_v0  ;;  %677 = vmatprep.subr.bf16.mxu1 %v874_v0 }
  0x5b   :  { %658 = vmatpush3.bf16.msra.mxu0 %v741_v7  ;;  %678 = vmatpush3.bf16.msra.mxu1 %v750_v12 }
  0x5c   :  { %659 = vmatprep.subr.bf16.mxu0 %v874_v0  ;;  %679 = vmatprep.subr.bf16.mxu1 %v874_v0 }
  0x5f   :  { %660 = vmatpush3.bf16.msra.mxu0 %v742_v9  ;;  %680 = vmatpush3.bf16.msra.mxu1 %v751_v14 }
  0x60   :  { %661 = vmatprep.subr.bf16.mxu0 %v874_v0  ;;  %681 = vmatprep.subr.bf16.mxu1 %v874_v0 }
  0x63   :  { %662 = vmatpush3.bf16.msra.mxu0 %v743_v11  ;;  %682 = vmatpush3.bf16.msra.mxu1 %v752_v16 }
  0x64   :  { %663 = vmatprep.subr.bf16.mxu0 %v874_v0  ;;  %683 = vmatprep.subr.bf16.mxu1 %v874_v0 }
  0x67   :  { %664 = vmatpush3.bf16.msra.mxu0 %v744_v13  ;;  %684 = vmatpush3.bf16.msra.mxu1 %v753_v17 }
  0x68   :  { %689 = vmatprep.subr.bf16.mxu0 %v874_v0  ;;  %709 = vmatprep.subr.bf16.mxu1 %v874_v0 }
  0x6a   :  { %666 = vmatmul.mubr.bf16.vlgmr.msra.gmra.mrb[0].mxu0 %v745_v15 }
  0x6b   :  { %705 = vmatprep.mubr.msk.bf16.mxu0 %vm875_vm0, %v874_v0  ;;  %690 = vmatpush3.bf16.msra.mxu0 %v754_v18 }
  0x6c   :  { %691 = vmatprep.subr.bf16.mxu0 %v874_v0 }
  0x6f   :  { %692 = vmatpush3.bf16.msra.mxu0 %v755_v19 }
  0x70   :  { %693 = vmatprep.subr.bf16.mxu0 %v874_v0 }
  0x73   :  { %694 = vmatpush3.bf16.msra.mxu0 %v756_v20 }
  0x74   :  { %695 = vmatprep.subr.bf16.mxu0 %v874_v0 }
  0x77   :  { %696 = vmatpush3.bf16.msra.mxu0 %v757_v21 }
  0x78   :  { %697 = vmatprep.subr.bf16.mxu0 %v874_v0 }
  0x7b   :  { %698 = vmatpush3.bf16.msra.mxu0 %v758_v22 }
  0x7c   :  { %699 = vmatprep.subr.bf16.mxu0 %v874_v0 }
  0x7f   :  { %700 = vmatpush3.bf16.msra.mxu0 %v759_v23 }
  0x80   :  { %701 = vmatprep.subr.bf16.mxu0 %v874_v0 }
  0x83   :  { %702 = vmatpush3.bf16.msra.mxu0 %v760_v36 }
  0x84   :  { %703 = vmatprep.subr.bf16.mxu0 %v874_v0 }
  0x87   :  { %704 = vmatpush3.bf16.msra.mxu0 %v761_v37 }
 0x13d   :  { %v201_v25 = vpop.f32.mrb[0].mxu0 }
 0x13e   :  { %v202_v26 = vadd.f32 %v576_v24, %v201_v25  ;;  %v667_v27 = vpop.f32.mrb[1].mxu0 }
 0x13f   :  { %v204_v28 = vpop.f32.mrb[2].mxu0 }
 0x140   :  { %v210_v29 = vmul.f32 0.1, %v202_v26  ;;  %v205_v30 = vadd.f32 %v576_v24, %v204_v28  ;;  %v668_v31 = vpop.f32.mrb[3].mxu0  ;;  %vm208_vm1 = vcmp.gt.f32.partialorder %v202_v26, 0.0 }
 0x142   :  { %vm209_vm2 = vcmp.gt.f32.partialorder %v205_v30, 0.0  ;;  %v211_v32 = vmul.f32 0.1, %v205_v30  ;;  %v212_v33 = vsel %vm208_vm1, %v202_v26, %v210_v29 }
 0x144   :  { %v213_v34 = vsel %vm209_vm2, %v205_v30, %v211_v32 }
 0x145   :  { %v214_v35 = vpack.c.bf16 %v213_v34, %v212_v33 }
 0x147   :  { %686 = vmatmul.mubr.bf16.vlgmr.msra.gmra.mrb[0].mxu1 %v214_v35 }
 0x148   :  { %725 = vmatprep.mubr.msk.bf16.mxu1 %vm875_vm0, %v874_v0  ;;  %710 = vmatpush3.bf16.msra.mxu1 %v762_v38 }
 0x149   :  { %711 = vmatprep.subr.bf16.mxu1 %v874_v0 }
 0x14c   :  { %712 = vmatpush3.bf16.msra.mxu1 %v763_v39 }
 0x14d   :  { %713 = vmatprep.subr.bf16.mxu1 %v874_v0 }
 0x150   :  { %714 = vmatpush3.bf16.msra.mxu1 %v764_v40 }
 0x151   :  { %715 = vmatprep.subr.bf16.mxu1 %v874_v0 }
 0x154   :  { %716 = vmatpush3.bf16.msra.mxu1 %v765_v41 }
 0x155   :  { %717 = vmatprep.subr.bf16.mxu1 %v874_v0 }
 0x158   :  { %718 = vmatpush3.bf16.msra.mxu1 %v766_v42 }
 0x159   :  { %719 = vmatprep.subr.bf16.mxu1 %v874_v0 }
 0x15c   :  { %720 = vmatpush3.bf16.msra.mxu1 %v767_v43 }
 0x15d   :  { %721 = vmatprep.subr.bf16.mxu1 %v874_v0 }
 0x160   :  { %722 = vmatpush3.bf16.msra.mxu1 %v768_v56 }
 0x161   :  { %723 = vmatprep.subr.bf16.mxu1 %v874_v0  ;;  %v604_v0 = vld [vmem:[%s1069_s8] ss:$0 sm:$0xff] }
 0x164   :  { %724 = vmatpush3.bf16.msra.mxu1 %v769_v57 }
 0x21a   :  { %v320_v45 = vpop.f32.mrb[0].mxu1 }
 0x21b   :  { %v321_v46 = vadd.f32 %v586_v44, %v320_v45  ;;  %v687_v47 = vpop.f32.mrb[1].mxu1 }
 0x21c   :  { %v323_v48 = vpop.f32.mrb[2].mxu1 }
 0x21d   :  { %v329_v49 = vmul.f32 0.1, %v321_v46  ;;  %v324_v50 = vadd.f32 %v586_v44, %v323_v48  ;;  %v688_v51 = vpop.f32.mrb[3].mxu1  ;;  %vm327_vm3 = vcmp.gt.f32.partialorder %v321_v46, 0.0 }
 0x21f   :  { %vm328_vm4 = vcmp.gt.f32.partialorder %v324_v50, 0.0  ;;  %v330_v52 = vmul.f32 0.1, %v324_v50  ;;  %v331_v53 = vsel %vm327_vm3, %v321_v46, %v329_v49 }
 0x221   :  { %v332_v54 = vsel %vm328_vm4, %v324_v50, %v330_v52 }
 0x222   :  { %v333_v55 = vpack.c.bf16 %v332_v54, %v331_v53 }
 0x224   :  { %706 = vmatmul.mubr.bf16.vlgmr.msra.gmra.mrb[4].mxu0 %v333_v55 }
 0x2f7   :  { %v439_v59 = vpop.f32.mrb[4].mxu0 }
 0x2f8   :  { %v440_v60 = vadd.f32 %v595_v58, %v439_v59  ;;  %v707_v61 = vpop.f32.mrb[5].mxu0 }
 0x2f9   :  { %v442_v62 = vpop.f32.mrb[6].mxu0 }
 0x2fa   :  { %v448_v63 = vmul.f32 0.1, %v440_v60  ;;  %v443_v1 = vadd.f32 %v595_v58, %v442_v62  ;;  %v708_v2 = vpop.f32.mrb[7].mxu0  ;;  %vm446_vm5 = vcmp.gt.f32.partialorder %v440_v60, 0.0 }
 0x2fc   :  { %vm447_vm6 = vcmp.gt.f32.partialorder %v443_v1, 0.0  ;;  %v449_v3 = vmul.f32 0.1, %v443_v1  ;;  %v450_v4 = vsel %vm446_vm5, %v440_v60, %v448_v63 }
 0x2fe   :  { %v451_v5 = vsel %vm447_vm6, %v443_v1, %v449_v3 }
 0x2ff   :  { %v452_v6 = vpack.c.bf16 %v451_v5, %v450_v4 }
 0x301   :  { %726 = vmatmul.mubr.bf16.vlgmr.msra.gmra.mrb[4].mxu1 %v452_v6 }
 0x3d4   :  { %v558_v7 = vpop.f32.mrb[4].mxu1 }
 0x3d5   :  { %v559_v8 = vadd.f32 %v604_v0, %v558_v7  ;;  %v727_v9 = vpop.f32.mrb[5].mxu1 }
 0x3d6   :  { %v561_v10 = vpop.f32.mrb[6].mxu1 }
 0x3d7   :  { %770 = vtanh.f32 %v559_v8  ;;  %v562_v11 = vadd.f32 %v604_v0, %v561_v10  ;;  %v728_v12 = vpop.f32.mrb[7].mxu1 }
 0x3d9   :  { %772 = vtanh.f32 %v562_v11 }
 0x3e1   :  { %v771_v13 = vpop.eup %770 }
 0x3e2   :  { %567 = vst [vmem:[%s1070_s9] sm:$0xff] %v771_v13 }
 0x3e3   :  { %v773_v14 = vpop.eup %772 }
 0x3e4   :  { %568 = vst [vmem:[%s1070_s9 + $0x8] sm:$0xff] %v773_v14 }
 0x3e5   :  { %573 = vsyncpa [#allocation3], 1 }
 0x3e6   :  { %574 = vsyncpa [#allocation5], 1 }
 0x3e7   :  { %575 = vsyncpa [#allocation8], 1 }

</bundles_post_ra>
